<compile_context>
chip_gen: v7x
topology: tpu7x:2x2x1
jax: 0.10.0
libtpu: 0.0.40
codegen_flags: <defaults>
</compile_context>

<pallas_src>
import functools

import jax
import jax.numpy as jnp
import numpy as np
from jax import lax
from jax.experimental import pallas as pl
from jax.experimental.pallas import tpu as pltpu


def _glcn_kernel(h_ref, a_ref, dsel_ref, diag_ref, bind_ref, A_ref, probs_ref,
                 *, feature_obs_size):
    # h_ref:     (B*N, feature_size)  VMEM -- raw (flattened) input features
    # a_ref:     (1, F_obs)           VMEM -- a_link as a lane-major row
    # dsel_ref:  (B*N, M_pad)         VMEM -- block-diagonal {0,+1,-1} pair selector
    # diag_ref:  (1, M_pad)           VMEM -- 1.0 on within-batch diagonal pairs
    # bind_ref:  (M_pad, B)           VMEM -- 1.0 on valid off-diag pairs of batch b
    # A_ref:     (1, M_pad)           VMEM -- flattened adjacency (lane-dense)
    # probs_ref: (1, B)               VMEM -- per-batch off-diagonal log-prob sums
    f_obs = feature_obs_size

    # Observed-feature slice (static lane prefix) + tiny in-kernel transpose so the
    # flattened pair index m = b*N*N + i*N + j lands on lanes for all later work.
    h_obs = h_ref[:, :f_obs]                 # (B*N, F)
    hT = h_obs.T                             # (F, B*N) -- one small XLU transpose

    # MXU pair expansion: diff[f, m] = |h[b, i, f] - h[b, j, f]| for m = (b, i, j).
    # HIGHEST + exact {0,+-1} selector reproduces the f32 differences exactly.
    diff = jnp.abs(
        jnp.dot(hT, dsel_ref[...],
                preferred_element_type=jnp.float32,
                precision=lax.Precision.HIGHEST))          # (F, M_pad)

    # Feature reduction on the MXU: logits[m] = sum_f a[f] * diff[f, m].
    logits = jnp.dot(a_ref[...], diff,
                     preferred_element_type=jnp.float32,
                     precision=lax.Precision.HIGHEST)      # (1, M_pad)

    # gumbel_sigmoid(rollout=True, tau=1, hard=True, threshold=0.5): forward value
    # of the straight-through estimator is the hard threshold of the sigmoid.
    p = jax.nn.sigmoid(logits)                             # (1, M_pad)
    y_hard = (p > 0.5).astype(jnp.float32)

    # A = A - diag(diag(A)) + I  ->  diagonal forced to 1, off-diagonal = y_hard.
    A_ref[...] = jnp.where(diag_ref[...] > 0.0, 1.0, y_hard)

    # selected = A*p + (1-A)*(1-p); always >= 0.5 so the log is finite everywhere
    # (diagonal / padding lanes are zeroed out by the block indicator below).
    selected = y_hard * p + (1.0 - y_hard) * (1.0 - p)
    logvals = jnp.log(selected + 1e-8)                     # (1, M_pad)

    # Per-batch off-diagonal sum via a block-indicator matmul.
    probs_ref[...] = jnp.dot(logvals, bind_ref[...],
                             preferred_element_type=jnp.float32,
                             precision=lax.Precision.HIGHEST)   # (1, B)


def _glcn_constants(batch, n, m_pad):
    """Grid-invariant constants, built once at trace time (hoisted out of kernel)."""
    nn = n * n
    d_sel = np.zeros((batch * n, m_pad), np.float32)
    diag = np.zeros((1, m_pad), np.float32)
    bind = np.zeros((m_pad, batch), np.float32)
    for b in range(batch):
        for i in range(n):
            for j in range(n):
                m = b * nn + i * n + j
                d_sel[b * n + i, m] += 1.0   # +h_i
                d_sel[b * n + j, m] -= 1.0   # -h_j (cancels to 0 on the diagonal)
                if i == j:
                    diag[0, m] = 1.0
                else:
                    bind[m, b] = 1.0         # also masks diagonal + lane padding
    return jnp.asarray(d_sel), jnp.asarray(diag), jnp.asarray(bind)


def glcn_forward(h, a_link, feature_obs_size):
    """JAX/Pallas equivalent of GLCN.forward(h, rollout=True)."""
    B, N, Fs = h.shape
    NN = N * N
    M = B * NN
    M_pad = ((M + 127) // 128) * 128         # lane-dense (unmasked) A store

    d_sel, diag, bind = _glcn_constants(B, N, M_pad)

    # Free, contiguous reshapes only -- no wrapper transpose / extra HBM roundtrip.
    h_flat = h.reshape(B * N, Fs).astype(jnp.float32)                 # (B*N, Fs)
    a_row = a_link.astype(jnp.float32).reshape(1, feature_obs_size)   # (1, F)

    kernel = functools.partial(_glcn_kernel, feature_obs_size=feature_obs_size)
    vmem = pl.BlockSpec(memory_space=pltpu.MemorySpace.VMEM)

    A_row, probs_row = pl.pallas_call(
        kernel,
        out_shape=(
            jax.ShapeDtypeStruct((1, M_pad), jnp.float32),  # flattened A (lane-dense)
            jax.ShapeDtypeStruct((1, B), jnp.float32),      # per-batch probs
        ),
        in_specs=[vmem, vmem, vmem, vmem, vmem],
        out_specs=(vmem, vmem),
    )(h_flat, a_row, d_sel, diag, bind)

    A = A_row[0, :M].reshape(B, N, N)
    probs = probs_row[0]
    if B == 1:                               # torch's A.squeeze(0)
        A = A[0]
    return A, probs


def init_a_link(key, feature_obs_size):
    # nn.init.xavier_uniform_(a_link, gain=1.414) on shape (feature_obs_size, 1)
    gain = 1.414
    fan_in, fan_out = feature_obs_size, 1
    bound = gain * jnp.sqrt(6.0 / (fan_in + fan_out))
    return jax.random.uniform(
        key, (feature_obs_size, 1), dtype=jnp.float32, minval=-bound, maxval=bound
    )


if __name__ == "__main__":
    # Small shapes consistent with the module:
    #   feature_size=48, graph_embedding_size=32 (unused in fwd), feature_obs_size=32
    #   h: (batch=2, n_agents=8, feature_size=48)
    B, N, feature_size, feature_obs_size = 2, 8, 48, 32

    key = jax.random.PRNGKey(0)
    k_h, k_a = jax.random.split(key)
    h = jax.random.normal(k_h, (B, N, feature_size), dtype=jnp.float32)
    a_link = init_a_link(k_a, feature_obs_size)

    fwd = jax.jit(functools.partial(glcn_forward, feature_obs_size=feature_obs_size))
    A, probs = fwd(h, a_link)
    jax.block_until_ready((A, probs))

    assert A.shape == (B, N, N)
    assert probs.shape == (B,)

    # Pure-JAX reference (same forward semantics) for a sanity check.
    h_obs = h[:, :, :feature_obs_size]
    diff_ref = jnp.abs(h_obs[:, :, None, :] - h_obs[:, None, :, :])
    logits_ref = jnp.sum(diff_ref * a_link[:, 0][None, None, None, :], axis=-1)
    p_ref = jax.nn.sigmoid(logits_ref)
    hard_ref = (p_ref > 0.5).astype(jnp.float32)
    eye = jnp.eye(N, dtype=bool)
    A_expect = jnp.where(eye[None], 1.0, hard_ref)
    sel_ref = hard_ref * p_ref + (1.0 - hard_ref) * (1.0 - p_ref)
    probs_expect = jnp.sum(
        jnp.where(eye[None], 0.0, jnp.log(sel_ref + 1e-8)), axis=(1, 2)
    )
    assert jnp.allclose(A, A_expect, atol=1e-6)
    assert jnp.allclose(probs, probs_expect, rtol=1e-4, atol=1e-3)

    print("KERNEL_OK")
</pallas_src>

<mosaic_0001>
module attributes {stable_mosaic.version = 11 : i64} {
  func.func @_glcn_kernel(%arg0: memref<16x48xf32, #tpu.memory_space<vmem>>, %arg1: memref<1x32xf32, #tpu.memory_space<vmem>>, %arg2: memref<16x128xf32, #tpu.memory_space<vmem>>, %arg3: memref<1x128xf32, #tpu.memory_space<vmem>>, %arg4: memref<128x2xf32, #tpu.memory_space<vmem>>, %arg5: memref<1x128xf32, #tpu.memory_space<vmem>>, %arg6: memref<1x2xf32, #tpu.memory_space<vmem>>) attributes {dimension_semantics = [], scalar_prefetch = 0 : i64, scratch_operands = 0 : i64, tpu.core_type = #tpu.core_type<tc>} {
    %c0 = arith.constant 0 : index
    %c0_0 = arith.constant 0 : index
    %0 = vector.load %arg0[%c0, %c0_0] : memref<16x48xf32, #tpu.memory_space<vmem>>, vector<16x32xf32>
    %1 = tpu.transpose %0, [1, 0] : vector<16x32xf32> -> vector<32x16xf32>
    %c0_1 = arith.constant 0 : index
    %c0_2 = arith.constant 0 : index
    %2 = vector.load %arg2[%c0_1, %c0_2] : memref<16x128xf32, #tpu.memory_space<vmem>>, vector<16x128xf32>
    %cst = arith.constant dense<0.000000e+00> : vector<32x128xf32>
    %3 = tpu.matmul %1, %2, %cst {dimension_numbers = #tpu.dot_dimension_numbers<[1], [0], [0], [1], [0, 0, 1, 1], [], []>, precision = #tpu.contract_precision<fp32>} : vector<32x16xf32>, vector<16x128xf32>, vector<32x128xf32> -> vector<32x128xf32>
    %4 = math.absf %3 : vector<32x128xf32>
    %c0_3 = arith.constant 0 : index
    %c0_4 = arith.constant 0 : index
    %5 = vector.load %arg1[%c0_3, %c0_4] : memref<1x32xf32, #tpu.memory_space<vmem>>, vector<1x32xf32>
    %cst_5 = arith.constant dense<0.000000e+00> : vector<1x128xf32>
    %6 = tpu.matmul %5, %4, %cst_5 {dimension_numbers = #tpu.dot_dimension_numbers<[1], [0], [0], [1], [0, 0, 1, 1], [], []>, precision = #tpu.contract_precision<fp32>} : vector<1x32xf32>, vector<32x128xf32>, vector<1x128xf32> -> vector<1x128xf32>
    %7 = arith.negf %6 : vector<1x128xf32>
    %8 = math.exp %7 : vector<1x128xf32>
    %cst_6 = arith.constant 1.000000e+00 : f32
    %9 = vector.broadcast %cst_6 : f32 to vector<1x128xf32>
    %10 = arith.addf %9, %8 : vector<1x128xf32>
    %11 = arith.divf %9, %10 : vector<1x128xf32>
    %cst_7 = arith.constant 5.000000e-01 : f32
    %12 = vector.broadcast %cst_7 : f32 to vector<1x128xf32>
    %13 = arith.cmpf ogt, %11, %12 : vector<1x128xf32>
    %14 = arith.extui %13 : vector<1x128xi1> to vector<1x128xi32>
    %15 = arith.sitofp %14 : vector<1x128xi32> to vector<1x128xf32>
    %c0_8 = arith.constant 0 : index
    %c0_9 = arith.constant 0 : index
    %16 = vector.load %arg3[%c0_8, %c0_9] : memref<1x128xf32, #tpu.memory_space<vmem>>, vector<1x128xf32>
    %cst_10 = arith.constant 0.000000e+00 : f32
    %17 = vector.broadcast %cst_10 : f32 to vector<1x128xf32>
    %18 = arith.cmpf ogt, %16, %17 : vector<1x128xf32>
    %cst_11 = arith.constant 1.000000e+00 : f32
    %19 = vector.broadcast %cst_11 : f32 to vector<1x128xf32>
    %20 = arith.select %18, %19, %15 : vector<1x128xi1>, vector<1x128xf32>
    %c0_12 = arith.constant 0 : index
    %c0_13 = arith.constant 0 : index
    %21 = vector.load %arg5[%c0_12, %c0_13] : memref<1x128xf32, #tpu.memory_space<vmem>>, vector<1x128xf32>
    tpu.vector_store %arg5[%c0_12, %c0_13], %20 {strides = array<i32>} : memref<1x128xf32, #tpu.memory_space<vmem>>, vector<1x128xf32>,
    %22 = arith.mulf %15, %11 : vector<1x128xf32>
    %cst_14 = arith.constant 1.000000e+00 : f32
    %23 = vector.broadcast %cst_14 : f32 to vector<1x128xf32>
    %24 = arith.subf %23, %15 : vector<1x128xf32>
    %cst_15 = arith.constant 1.000000e+00 : f32
    %25 = vector.broadcast %cst_15 : f32 to vector<1x128xf32>
    %26 = arith.subf %25, %11 : vector<1x128xf32>
    %27 = arith.mulf %24, %26 : vector<1x128xf32>
    %28 = arith.addf %22, %27 : vector<1x128xf32>
    %cst_16 = arith.constant 9.99999993E-9 : f32
    %29 = vector.broadcast %cst_16 : f32 to vector<1x128xf32>
    %30 = arith.addf %28, %29 : vector<1x128xf32>
    %31 = math.log %30 : vector<1x128xf32>
    %c0_17 = arith.constant 0 : index
    %c0_18 = arith.constant 0 : index
    %32 = vector.load %arg4[%c0_17, %c0_18] : memref<128x2xf32, #tpu.memory_space<vmem>>, vector<128x2xf32>
    %cst_19 = arith.constant dense<0.000000e+00> : vector<1x2xf32>
    %33 = tpu.matmul %31, %32, %cst_19 {dimension_numbers = #tpu.dot_dimension_numbers<[1], [0], [0], [1], [0, 0, 1, 1], [], []>, precision = #tpu.contract_precision<fp32>} : vector<1x128xf32>, vector<128x2xf32>, vector<1x2xf32> -> vector<1x2xf32>
    %c0_20 = arith.constant 0 : index
    %c0_21 = arith.constant 0 : index
    %34 = vector.load %arg6[%c0_20, %c0_21] : memref<1x2xf32, #tpu.memory_space<vmem>>, vector<1x2xf32>
    tpu.vector_store %arg6[%c0_20, %c0_21], %33 {strides = array<i32>} : memref<1x2xf32, #tpu.memory_space<vmem>>, vector<1x2xf32>,
    return
  }
}

</mosaic_0001>

<bundles_post_ra>
// kernel: squeeze.2
= control target key start
LH: loop header
LB: loop body
LE: loop exit
PB: predicated region body
PF: predicated region fallthrough
CT: control target
= control target key end

     0   :  { %s207_s0 = inlined_call_operand.vmem [shape: f32[128], index: 0, kind: input, shape index: {}]   ;;  %s208_s1 = inlined_call_operand.hbm [shape: f32[2,8,8], index: 1, kind: output, shape index: {}]  }
   0x1   :  { %v5_v0 = vld [vmem:[%s207_s0] sm:$0x1] }
   0x2   :  { %6 = vst [vmem:[#allocation2] sm:$0x1] %v5_v0 }
   0x3   :  { %2 = vsyncpa [#allocation1], 0  ;;  %s150_s0 = smov 120   ;;  %s151_s8 = smov 104   ;;  %vm8_vm0 = vcmask 64512  }
   0x4   :  { %s152_s9 = smov 112   ;;  %s153_s10 = smov 96  }
   0x5   :  { %s154_s11 = smov 88   ;;  %s155_s12 = smov 80  }
   0x6   :  { %s156_s13 = smov 72   ;;  %s157_s14 = smov 64  }
   0x7   :  { %s158_s15 = smov 56   ;;  %s159_s16 = smov 48  }
   0x8   :  { %s160_s17 = smov 40   ;;  %s161_s18 = smov 32  }
   0x9   :  { %v10_v1 = vld [vmem:[#allocation2] sm:$0x1]   ;;  %s162_s19 = smov 24   ;;  %s163_s20 = smov 16  }
   0xa   :  { %v22_v2 = vld [vmem:[#allocation2] sm:$0x1]   ;;  %11 = vrot.lane.b32.xlu0 %v10_v1, %s150_s0  ;;  %s164_s21 = smov 8   ;;  %s165_s22 = smov [#allocation0]  }
   0xb   :  { %23 = vrot.lane.b32.xlu1 %v22_v2, %s151_s8  ;;  %v16_v3 = vld [vmem:[#allocation2] sm:$0x1]   ;;  %s104_s23 = sshll.u32 %s165_s22, 4  ;;  %s105_s23 = int_to_ptr.vmem [resolvable:$true] %s104_s23 }
   0xc   :  { %v28_v4 = vld [vmem:[#allocation2] sm:$0x1]   ;;  %s126_s24 = scalar_lea.vmem %s105_s23, 256  ;;  %p131_p1 = scmp.lt.s32.totalorder %s105_s23, %s105_s23 }
   0xd   :  { %v34_v5 = vld [vmem:[#allocation2] sm:$0x1]   ;;  %p127_p0 = scmp.ne.s32.totalorder %s105_s23, %s126_s24  ;;  %p132_p2 = scmp.lt.s32.totalorder %s126_s24, %s126_s24 }
   0xe   :  { %17 = vrot.lane.b32.xlu0 %v16_v3, %s152_s9  ;;  %v40_v6 = vld [vmem:[#allocation2] sm:$0x1]  }
   0xf   :  { %29 = vrot.lane.b32.xlu1 %v28_v4, %s153_s10  ;;  %v46_v7 = vld [vmem:[#allocation2] sm:$0x1]   ;;  %p133_p3 = por %p132_p2, %p131_p1 }
  0x10   :  { %v52_v8 = vld [vmem:[#allocation2] sm:$0x1]  }
  0x11   :  { %v58_v9 = vld [vmem:[#allocation2] sm:$0x1]   ;;  %p134_p4 = pnand %p133_p3, %p127_p0 }
  0x12   :  { %35 = vrot.lane.b32.xlu0 %v34_v5, %s154_s11  ;;  %v64_v10 = vld [vmem:[#allocation2] sm:$0x1]  }
  0x13   :  { %41 = vrot.lane.b32.xlu1 %v40_v6, %s155_s12  ;;  %v7_v11 = vld [vmem:[#allocation2] sm:$0x1]  }
  0x14   :  { %9 = vst.msk [vmem:[#allocation0] sm:$0x1] %vm8_vm0, %v7_v11   ;;  %v70_v12 = vld [vmem:[#allocation2] sm:$0x1]  }
  0x15   :  { %v76_v13 = vld [vmem:[#allocation2] sm:$0x1]  }
  0x16   :  { %47 = vrot.lane.b32.xlu0 %v46_v7, %s156_s13  ;;  %v82_v14 = vld [vmem:[#allocation2] sm:$0x1]  }
  0x17   :  { %53 = vrot.lane.b32.xlu1 %v52_v8, %s157_s14  ;;  %v88_v15 = vld [vmem:[#allocation2] sm:$0x1]  }
  0x18   :  { %v94_v16 = vld [vmem:[#allocation2] sm:$0x1]  }
  0x1a   :  { %59 = vrot.lane.b32.xlu0 %v58_v9, %s158_s15 }
  0x1b   :  { %65 = vrot.lane.b32.xlu1 %v64_v10, %s159_s16 }
  0x1e   :  { %71 = vrot.lane.b32.xlu0 %v70_v12, %s160_s17 }
  0x1f   :  { %77 = vrot.lane.b32.xlu1 %v76_v13, %s161_s18 }
  0x22   :  { %83 = vrot.lane.b32.xlu0 %v82_v14, %s162_s19 }
  0x23   :  { %89 = vrot.lane.b32.xlu1 %v88_v15, %s163_s20 }
  0x26   :  { %95 = vrot.lane.b32.xlu0 %v94_v16, %s164_s21 }
  0x7c   :  { %v12_v17 = vpop.permute.xlu0 %11  }
  0x7d   :  { %v24_v18 = vpop.permute.xlu1 %23   ;;  %15 = vst.msk [vmem:[#allocation0 + $0x1] sm:$0x1] %vm8_vm0, %v12_v17  }
  0x7e   :  { %27 = vst.msk [vmem:[#allocation0 + $0x3] sm:$0x1] %vm8_vm0, %v24_v18  }
  0x80   :  { %v18_v19 = vpop.permute.xlu0 %17  }
  0x81   :  { %v30_v20 = vpop.permute.xlu1 %29   ;;  %21 = vst.msk [vmem:[#allocation0 + $0x2] sm:$0x1] %vm8_vm0, %v18_v19  }
  0x82   :  { %33 = vst.msk [vmem:[#allocation0 + $0x4] sm:$0x1] %vm8_vm0, %v30_v20  }
  0x84   :  { %v36_v21 = vpop.permute.xlu0 %35  }
  0x85   :  { %v42_v22 = vpop.permute.xlu1 %41   ;;  %39 = vst.msk [vmem:[#allocation0 + $0x5] sm:$0x1] %vm8_vm0, %v36_v21  }
  0x86   :  { %45 = vst.msk [vmem:[#allocation0 + $0x6] sm:$0x1] %vm8_vm0, %v42_v22  }
  0x88   :  { %v48_v23 = vpop.permute.xlu0 %47  }
  0x89   :  { %v54_v24 = vpop.permute.xlu1 %53   ;;  %51 = vst.msk [vmem:[#allocation0 + $0x7] sm:$0x1] %vm8_vm0, %v48_v23  }
  0x8a   :  { %57 = vst.msk [vmem:[#allocation0 + $0x8] sm:$0x1] %vm8_vm0, %v54_v24  }
  0x8c   :  { %v60_v25 = vpop.permute.xlu0 %59  }
  0x8d   :  { %v66_v26 = vpop.permute.xlu1 %65   ;;  %63 = vst.msk [vmem:[#allocation0 + $0x9] sm:$0x1] %vm8_vm0, %v60_v25  }
  0x8e   :  { %69 = vst.msk [vmem:[#allocation0 + $0xa] sm:$0x1] %vm8_vm0, %v66_v26  }
  0x90   :  { %v72_v27 = vpop.permute.xlu0 %71  }
  0x91   :  { %v78_v28 = vpop.permute.xlu1 %77   ;;  %75 = vst.msk [vmem:[#allocation0 + $0xb] sm:$0x1] %vm8_vm0, %v72_v27  }
  0x92   :  { %81 = vst.msk [vmem:[#allocation0 + $0xc] sm:$0x1] %vm8_vm0, %v78_v28  }
  0x94   :  { %v84_v29 = vpop.permute.xlu0 %83  }
  0x95   :  { %v90_v30 = vpop.permute.xlu1 %89   ;;  %87 = vst.msk [vmem:[#allocation0 + $0xd] sm:$0x1] %vm8_vm0, %v84_v29  }
  0x96   :  { %93 = vst.msk [vmem:[#allocation0 + $0xe] sm:$0x1] %vm8_vm0, %v90_v30  }
  0x98   :  { %v96_v31 = vpop.permute.xlu0 %95  }
  0x99   :  { %99 = vst.msk [vmem:[#allocation0 + $0xf] sm:$0x1] %vm8_vm0, %v96_v31  }
  0x9a   :  { %137 = shalt.err (!%p134_p4)
}
  0x9b   :  { %s138_s27 = scalar_lea.hbm %s208_s1, 256 }
  0x9c   :  { %p139_p5 = scmp.ne.s32.totalorder %s208_s1, %s138_s27  ;;  %p142_p6 = scmp.lt.u32.totalorder %s138_s27, %s208_s1 }
  0x9e   :  { %p144_p7 = pnand %p142_p6, %p139_p5 }
  0xa0   :  { %147 = shalt.err (!%p144_p7)
}
  0xa1   :  { %107 = dma.vmem_to_hbm [thread:$0]  %s105_s23, 256, %s208_s1, [#allocation1]  }
  0xa2   :  { %148 = dma.done.wait [#allocation1], 256  }
  0xa3   :  { %149 = vsyncadd [#allocation1], 4294967040 }
  0xa4   :  { %109 = vsyncpa [#allocation1], 1 }

// kernel: glcn_forward.1
= control target key start
LH: loop header
LB: loop body
LE: loop exit
PB: predicated region body
PF: predicated region fallthrough
CT: control target
= control target key end

     0   :  { %12 = vsyncpa [#allocation3], 0  ;;  %s3117_s0 = inlined_call_operand.hbm [shape: f32[16,48], index: 0, kind: input, shape index: {}]   ;;  %s3118_s1 = inlined_call_operand.vmem [shape: f32[1,32], index: 1, kind: input, shape index: {}]   ;;  %s3119_s2 = inlined_call_operand.vmem [shape: f32[16,128], index: 2, kind: input, shape index: {}]   ;;  %s3120_s3 = inlined_call_operand.vmem [shape: f32[1,128], index: 3, kind: input, shape index: {}]   ;;  %s3121_s4 = inlined_call_operand.hbm [shape: f32[128,2], index: 4, kind: input, shape index: {}]   ;;  %s3122_s5 = inlined_call_operand.vmem [shape: f32[1,128], index: 5, kind: output, shape index: {0}]   ;;  %s3123_s6 = inlined_call_operand.hbm [shape: f32[1,2], index: 6, kind: output, shape index: {1}]  }
   0x1   :  { %13 = vsyncpa [#allocation6], 0 }
   0x2   :  { %14 = vsyncpa [#allocation4], 0  ;;  %s2717_s21 = smov [#allocation2]   ;;  %s2645_s25 = scalar_lea.hbm %s3117_s0, 256 }
   0x3   :  { %s20_s22 = sshll.u32 %s2717_s21, 4  ;;  %p2646_p0 = scmp.ne.s32.totalorder %s3117_s0, %s2645_s25  ;;  %s21_s22 = int_to_ptr.vmem [resolvable:$true] %s20_s22 }
   0x4   :  { %p2649_p1 = scmp.lt.u32.totalorder %s2645_s25, %s3117_s0 }
   0x6   :  { %p2651_p2 = pnand %p2649_p1, %p2646_p0 }
   0x8   :  { %2654 = shalt.err (!%p2651_p2)
}
   0x9   :  { %s2655_s30 = scalar_lea.vmem %s21_s22, 256  ;;  %p2660_p4 = scmp.lt.s32.totalorder %s21_s22, %s21_s22 }
   0xa   :  { %p2656_p3 = scmp.ne.s32.totalorder %s21_s22, %s2655_s30  ;;  %p2661_p5 = scmp.lt.s32.totalorder %s2655_s30, %s2655_s30 }
   0xc   :  { %p2662_p6 = por %p2661_p5, %p2660_p4 }
   0xe   :  { %p2663_p7 = pnand %p2662_p6, %p2656_p3 }
  0x10   :  { %2666 = shalt.err (!%p2663_p7)
}
  0x11   :  { %s2718_s7 = smov 128   ;;  %s2719_s8 = smov 8  }
  0x12   :  { %26 = dma.hbm_to_vmem [thread:$0]  %s3117_s0, 256, %s21_s22, [#allocation3], %s2718_s7, %s2718_s7, %s2719_s8  }
  0x13   :  { %s2720_s11 = smov [#allocation5]   ;;  %s2667_s15 = scalar_lea.hbm %s3121_s4, 2048 }
  0x14   :  { %s38_s12 = sshll.u32 %s2720_s11, 4  ;;  %p2668_p8 = scmp.ne.s32.totalorder %s3121_s4, %s2667_s15  ;;  %s39_s12 = int_to_ptr.vmem [resolvable:$true] %s38_s12 }
  0x15   :  { %p2671_p9 = scmp.lt.u32.totalorder %s2667_s15, %s3121_s4 }
  0x17   :  { %p2673_p10 = pnand %p2671_p9, %p2668_p8 }
  0x19   :  { %2676 = shalt.err (!%p2673_p10)
}
  0x1a   :  { %s2677_s20 = scalar_lea.vmem %s39_s12, 2048  ;;  %p2682_p12 = scmp.lt.s32.totalorder %s39_s12, %s39_s12 }
  0x1b   :  { %p2678_p11 = scmp.ne.s32.totalorder %s39_s12, %s2677_s20  ;;  %p2683_p13 = scmp.lt.s32.totalorder %s2677_s20, %s2677_s20 }
  0x1d   :  { %p2684_p0 = por %p2683_p13, %p2682_p12 }
  0x1f   :  { %p2685_p1 = pnand %p2684_p0, %p2678_p11 }
  0x21   :  { %2688 = shalt.err (!%p2685_p1)
}
  0x22   :  { %44 = dma.hbm_to_vmem [thread:$0]  %s3121_s4, 2048, %s39_s12, [#allocation6], %s2718_s7, %s2718_s7, %s2719_s8  }
  0x23   :  { %2711 = dma.done.wait [#allocation3], 256  }
  0x24   :  { %2712 = vsyncadd [#allocation3], 4294967040 }
  0x25   :  { %2713 = dma.done.wait [#allocation6], 2048  }
  0x26   :  { %2714 = vsyncadd [#allocation6], 4294965248  ;;  %v51_v0 = vld [vmem:[#allocation2] sm:$0xff]  ;;  %v52_v1 = vld [vmem:[#allocation2 + $0x8] sm:$0xff]  ;;  %vm87_vm0 = vcmask 130048   ;;  %v2721_v46 = vmov 0.0|0.0  }
  0x27   :  { %53 = vxpose.xlu0.b32.start [1/2] (short) (narrow) %v51_v0, 32  ;;  %v85_v2 = vld [vmem:[%s3119_s2] sm:$0xff]  ;;  %v86_v3 = vld [vmem:[%s3119_s2 + $0x8] sm:$0xff]  ;;  %2412 = vmatprep.subr.bf16.mxu1 %v2721_v46  ;;  %vm2722_vm1 = vmmov 0   ;;  %v2723_v47 = vmov 0.0   ;;  %vm693_vm2 = vcmask 261120  }
  0x28   :  { %v101_v4 = vand.u32 4294901760, %v85_v2  ;;  %v104_v5 = vand.u32 4294901760, %v86_v3  ;;  %2120 = vmatprep.mubr.msk.f32.mxu1 %vm2722_vm1, %v2723_v47  ;;  %v692_v48 = vld [vmem:[%s3118_s1] sm:$0x1]  ;;  %vm1860_vm5 = vcmask 8192  }
  0x29   :  { %v695_v49 = vsel %vm693_vm2, %v692_v48, 0  ;;  %v1212_v48 = vld [vmem:[#allocation5 + $0x48] sm:$0xff] }
  0x2a   :  { %v2790_v6 = vpack.c.bf16 %v104_v5, %v101_v4  ;;  %v209_v7 = vsub.f32 %v85_v2, %v101_v4  ;;  %v216_v8 = vsub.f32 %v86_v3, %v104_v5  ;;  %v2811_v50 = vand.u32 4294901760, %v695_v49 }
  0x2b   :  { %54 = vxpose.xlu0.b32.end [2/2] (short) (narrow) %v52_v1, 32 }
  0x2c   :  { %2389 = vmatprep.subr.bf16.mxu0 %v2790_v6  ;;  %v210_v9 = vand.u32 4294901760, %v209_v7  ;;  %v217_v10 = vand.u32 4294901760, %v216_v8  ;;  %v2396_v16 = vpack.c.bf16 %v216_v8, %v209_v7  ;;  %v767_v51 = vsub.f32 %v695_v49, %v2811_v50  ;;  %v1213_v49 = vld [vmem:[#allocation5 + $0x50] sm:$0xff] }
  0x2d   :  { %2391 = vmatpush3.bf16.msra.mxu0 %v2790_v6 }
  0x2e   :  { %v211_v11 = vsub.f32 %v209_v7, %v210_v9  ;;  %v218_v12 = vsub.f32 %v216_v8, %v217_v10  ;;  %v2404_v17 = vpack.c.bf16 %v217_v10, %v210_v9  ;;  %v768_v57 = vand.u32 4294901760, %v767_v51 }
  0x30   :  { %v212_v13 = vand.u32 4294901760, %v211_v11  ;;  %v219_v14 = vand.u32 4294901760, %v218_v12  ;;  %v769_v4 = vsub.f32 %v767_v51, %v768_v57 }
  0x32   :  { %v2392_v15 = vpack.c.bf16 %v219_v14, %v212_v13 }
  0x34   :  { %2393 = vmatprep.subr.bf16.mxu0 %v2392_v15 }
  0xa7   :  { %v69_v18 = vpop.trf.xlu0 }
  0xa8   :  { %v89_v19 = vsel %vm87_vm0, %v69_v18, 0 }
  0xa9   :  { %v167_v20 = vand.u32 4294901760, %v89_v19 }
  0xab   :  { %v168_v21 = vsub.f32 %v89_v19, %v167_v20  ;;  %v70_v22 = vpop.trf.xlu0 }
  0xac   :  { %v92_v23 = vsel %vm87_vm0, %v70_v22, 0 }
  0xad   :  { %v177_v24 = vand.u32 4294901760, %v92_v23  ;;  %v169_v25 = vand.u32 4294901760, %v168_v21 }
  0xaf   :  { %v178_v26 = vsub.f32 %v92_v23, %v177_v24  ;;  %v71_v27 = vpop.trf.xlu0  ;;  %v170_v28 = vsub.f32 %v168_v21, %v169_v25 }
  0xb0   :  { %v95_v29 = vsel %vm87_vm0, %v71_v27, 0  ;;  %v1203_v27 = vld [vmem:[#allocation5] sm:$0xff] }
  0xb1   :  { %v179_v30 = vand.u32 4294901760, %v178_v26  ;;  %v187_v31 = vand.u32 4294901760, %v95_v29  ;;  %v171_v32 = vand.u32 4294901760, %v170_v28  ;;  %v1204_v28 = vld [vmem:[#allocation5 + $0x8] sm:$0xff] }
  0xb3   :  { %v188_v33 = vsub.f32 %v95_v29, %v187_v31  ;;  %2056 = vmatprep.mubr.f32.mxu0 %v171_v32  ;;  %v72_v34 = vpop.trf.xlu0  ;;  %v180_v35 = vsub.f32 %v178_v26, %v179_v30  ;;  %v1205_v29 = vld [vmem:[#allocation5 + $0x10] sm:$0xff]  ;;  %v1206_v32 = vld [vmem:[#allocation5 + $0x18] sm:$0xff] }
  0xb4   :  { %v98_v36 = vsel %vm87_vm0, %v72_v34, 0  ;;  %v1207_v34 = vld [vmem:[#allocation5 + $0x20] sm:$0xff] }
  0xb5   :  { %v189_v37 = vand.u32 4294901760, %v188_v33  ;;  %v197_v38 = vand.u32 4294901760, %v98_v36  ;;  %v181_v39 = vand.u32 4294901760, %v180_v35  ;;  %v1208_v35 = vld [vmem:[#allocation5 + $0x28] sm:$0xff] }
  0xb7   :  { %v198_v40 = vsub.f32 %v98_v36, %v197_v38  ;;  %2057 = vmatmul.mubr.f32.vlgmr.msra.gmra.mrb[0].mxu0 %v181_v39  ;;  %v190_v41 = vsub.f32 %v188_v33, %v189_v37  ;;  %v1229_v36 = vand.u32 4294901760, %v1206_v32  ;;  %v1209_v39 = vld [vmem:[#allocation5 + $0x30] sm:$0xff] }
  0xb8   :  { %2395 = vmatpush3.bf16.msra.mxu0 %v2392_v15 }
  0xb9   :  { %v199_v42 = vand.u32 4294901760, %v198_v40  ;;  %v191_v43 = vand.u32 4294901760, %v190_v41  ;;  %2397 = vmatprep.subr.bf16.mxu0 %v2396_v16  ;;  %v1211_v41 = vld [vmem:[#allocation5 + $0x40] sm:$0xff] }
  0xbb   :  { %2059 = vmatprep.mubr.f32.mxu0 %v191_v43  ;;  %v200_v44 = vsub.f32 %v198_v40, %v199_v42 }
  0xbd   :  { %v201_v45 = vand.u32 4294901760, %v200_v44 }
  0xbf   :  { %2060 = vmatmul.mubr.f32.gmra.mrb[2].mxu0 %v201_v45 }
  0xc0   :  { %2066 = vmatprep.mubr.f32.mxu0 %v167_v20 }
  0xc3   :  { %2067 = vmatmul.mubr.f32.vlgmr.msra.gmra.mrb[0].mxu0 %v177_v24 }
  0xc4   :  { %2069 = vmatprep.mubr.f32.mxu0 %v187_v31  ;;  %2399 = vmatpush3.bf16.msra.mxu0 %v2396_v16  ;;  %v770_v16 = vand.u32 4294901760, %v769_v4  ;;  %v1218_v4 = vld [vmem:[#allocation5 + $0x78] sm:$0xff] }
  0xc5   :  { %2401 = vmatprep.subr.bf16.mxu0 %v2790_v6 }
  0xc7   :  { %2070 = vmatmul.mubr.f32.gmra.mrb[2].mxu0 %v197_v38 }
  0xc8   :  { %2076 = vmatprep.mubr.f32.mxu0 %v168_v21 }
  0xcb   :  { %2077 = vmatmul.mubr.f32.vlgmr.msra.gmra.mrb[0].mxu0 %v178_v26 }
  0xcc   :  { %2079 = vmatprep.mubr.f32.mxu0 %v188_v33  ;;  %2403 = vmatpush3.bf16.msra.mxu0 %v2790_v6  ;;  %v1226_v33 = vand.u32 4294901760, %v1205_v29 }
  0xcd   :  { %2405 = vmatprep.subr.bf16.mxu0 %v2404_v17 }
  0xce   :  { %v2847_v45 = vsub.f32 %v1205_v29, %v1226_v33 }
  0xcf   :  { %2080 = vmatmul.mubr.f32.gmra.mrb[2].mxu0 %v198_v40  ;;  %v1210_v40 = vld [vmem:[#allocation5 + $0x38] sm:$0xff] }
  0xd0   :  { %2086 = vmatprep.mubr.f32.mxu0 %v169_v25 }
  0xd3   :  { %2087 = vmatmul.mubr.f32.vlgmr.msra.gmra.mrb[0].mxu0 %v179_v30  ;;  %v1220_v30 = vand.u32 4294901760, %v1203_v27 }
  0xd4   :  { %2089 = vmatprep.mubr.f32.mxu0 %v189_v37  ;;  %2407 = vmatpush3.bf16.msra.mxu0 %v2404_v17  ;;  %v1232_v37 = vand.u32 4294901760, %v1207_v34 }
  0xd5   :  { %2409 = vmatprep.subr.bf16.mxu0 %v2790_v6  ;;  %v2843_v43 = vsub.f32 %v1203_v27, %v1220_v30 }
  0xd7   :  { %2090 = vmatmul.mubr.f32.gmra.mrb[2].mxu0 %v199_v42 }
  0xd8   :  { %2096 = vmatprep.mubr.f32.mxu0 %v167_v20 }
  0xdb   :  { %2097 = vmatmul.mubr.f32.vlgmr.msra.gmra.mrb[0].mxu0 %v177_v24 }
  0xdc   :  { %2099 = vmatprep.mubr.f32.mxu0 %v187_v31  ;;  %2411 = vmatpush3.bf16.msra.mxu0 %v2790_v6 }
  0xdd   :  { %2520 = vmatprep.subr.bf16.mxu0 %v2721_v46 }
  0xdf   :  { %2100 = vmatmul.mubr.f32.gmra.mrb[2].mxu0 %v197_v38 }
  0xe0   :  { %2106 = vmatprep.mubr.f32.mxu0 %v167_v20 }
  0xe3   :  { %2107 = vmatmul.mubr.f32.vlgmr.msra.gmra.mrb[0].mxu0 %v177_v24 }
  0xe4   :  { %2109 = vmatprep.mubr.f32.mxu0 %v187_v31  ;;  %v1223_v31 = vand.u32 4294901760, %v1204_v28 }
  0xe6   :  { %v2841_v42 = vpack.c.bf16 %v1223_v31, %v1220_v30  ;;  %v2845_v44 = vsub.f32 %v1204_v28, %v1223_v31  ;;  %v1327_v28 = vand.u32 4294901760, %v2847_v45 }
  0xe7   :  { %2110 = vmatmul.mubr.f32.gmra.mrb[2].mxu0 %v197_v38  ;;  %v1235_v38 = vand.u32 4294901760, %v1208_v35 }
  0xe8   :  { %2315 = vmatprep.mubr.msk.f32.mxu0 %vm2722_vm1, %v2723_v47  ;;  %2522 = vmatpush3.bf16.msra.mxu0 %v2841_v42 }
  0xe9   :  { %2523 = vmatprep.subr.bf16.mxu0 %v2721_v46 }
 0x1b6   :  { %v2108_v52 = vpop.f32.mrb[0].mxu0 }
 0x1b7   :  { %v689_v53 = vand.u32 2147483647, %v2108_v52  ;;  %v666_v54 = vpop.f32.mrb[1].mxu0  ;;  %v2851_v52 = vsub.f32 %v1206_v32, %v1229_v36  ;;  %v1328_v32 = vsub.f32 %v2847_v45, %v1327_v28 }
 0x1b8   :  { %v688_v55 = vand.u32 2147483647, %v666_v54  ;;  %v1215_v54 = vld [vmem:[#allocation5 + $0x60] sm:$0xff] }
 0x1b9   :  { %v701_v56 = vand.u32 4294901760, %v689_v53  ;;  %v1334_v29 = vand.u32 4294901760, %v2851_v52 }
 0x1ba   :  { %v698_v58 = vand.u32 4294901760, %v688_v55  ;;  %v2111_v59 = vpop.f32.mrb[2].mxu0 }
 0x1bb   :  { %v785_v60 = vsub.f32 %v689_v53, %v701_v56  ;;  %v691_v61 = vand.u32 2147483647, %v2111_v59  ;;  %v678_v62 = vpop.f32.mrb[3].mxu0  ;;  %v2853_v53 = vsub.f32 %v1207_v34, %v1232_v37  ;;  %v1247_v59 = vand.u32 4294901760, %v1212_v48 }
 0x1bc   :  { %v778_v63 = vsub.f32 %v688_v55, %v698_v58  ;;  %v690_v0 = vand.u32 2147483647, %v678_v62  ;;  %v2413_v1 = vpack.c.bf16 %v701_v56, %v698_v58  ;;  %v2857_v55 = vsub.f32 %v1208_v35, %v1235_v38  ;;  %v1216_v62 = vld [vmem:[#allocation5 + $0x68] sm:$0xff] }
 0x1bd   :  { %v786_v2 = vand.u32 4294901760, %v785_v60  ;;  %v707_v3 = vand.u32 4294901760, %v691_v61  ;;  %v1238_v56 = vand.u32 4294901760, %v1209_v39  ;;  %v1244_v58 = vand.u32 4294901760, %v1211_v41 }
 0x1be   :  { %v779_v5 = vand.u32 4294901760, %v778_v63  ;;  %v2425_v6 = vpack.c.bf16 %v785_v60, %v778_v63  ;;  %v704_v7 = vand.u32 4294901760, %v690_v0  ;;  %2414 = vmatpush3.bf16.msra.mxu1 %v2413_v1  ;;  %v2931_v31 = vpack.c.bf16 %v1334_v29, %v1327_v28 }
 0x1bf   :  { %v787_v8 = vsub.f32 %v785_v60, %v786_v2  ;;  %v799_v9 = vsub.f32 %v691_v61, %v707_v3  ;;  %2415 = vmatprep.subr.bf16.mxu1 %v2721_v46  ;;  %v1250_v60 = vand.u32 4294901760, %v1213_v49  ;;  %v1329_v34 = vand.u32 4294901760, %v1328_v32 }
 0x1c0   :  { %v780_v10 = vsub.f32 %v778_v63, %v779_v5  ;;  %v792_v11 = vsub.f32 %v690_v0, %v704_v7  ;;  %v2416_v12 = vpack.c.bf16 %v707_v3, %v704_v7  ;;  %v2437_v13 = vpack.c.bf16 %v786_v2, %v779_v5  ;;  %v1217_v63 = vld [vmem:[#allocation5 + $0x70] sm:$0xff] }
 0x1c1   :  { %v788_v14 = vand.u32 4294901760, %v787_v8  ;;  %v800_v15 = vand.u32 4294901760, %v799_v9  ;;  %v2861_v0 = vsub.f32 %v1209_v39, %v1238_v56  ;;  %v2865_v2 = vsub.f32 %v1211_v41, %v1244_v58 }
 0x1c2   :  { %v781_v17 = vand.u32 4294901760, %v780_v10  ;;  %v793_v18 = vand.u32 4294901760, %v792_v11  ;;  %v2428_v19 = vpack.c.bf16 %v799_v9, %v792_v11  ;;  %2417 = vmatpush3.bf16.msra.mxu1 %v2416_v12  ;;  %v1256_v3 = vand.u32 4294901760, %v1215_v54 }
 0x1c3   :  { %v801_v20 = vsub.f32 %v799_v9, %v800_v15  ;;  %2418 = vmatprep.subr.bf16.mxu1 %v2721_v46  ;;  %v2867_v5 = vpack.c.bf16 %v1235_v38, %v1232_v37  ;;  %v2871_v7 = vsub.f32 %v1213_v49, %v1250_v60  ;;  %v1259_v9 = vand.u32 4294901760, %v1216_v62 }
 0x1c4   :  { %v794_v21 = vsub.f32 %v792_v11, %v793_v18  ;;  %v2419_v22 = vpack.c.bf16 %v788_v14, %v781_v17  ;;  %v2440_v23 = vpack.c.bf16 %v800_v15, %v793_v18  ;;  %v2877_v10 = vsub.f32 %v1215_v54, %v1256_v3 }
 0x1c5   :  { %v802_v24 = vand.u32 4294901760, %v801_v20  ;;  %2121 = vmatmul.mubr.f32.vlgmr.msra.gmra.mrb[0].mxu1 %v770_v16  ;;  %v1262_v11 = vand.u32 4294901760, %v1217_v63  ;;  %v2895_v17 = vpack.c.bf16 %v1247_v59, %v1244_v58  ;;  %v1348_v37 = vand.u32 4294901760, %v2857_v55 }
 0x1c6   :  { %v795_v25 = vand.u32 4294901760, %v794_v21  ;;  %2420 = vmatpush3.bf16.msra.mxu1 %v2419_v22  ;;  %2131 = vmatprep.mubr.msk.f32.mxu1 %vm2722_vm1, %v2723_v47  ;;  %v1313_v21 = vand.u32 4294901760, %v2843_v43  ;;  %v1320_v22 = vand.u32 4294901760, %v2845_v44 }
 0x1c7   :  { %2421 = vmatprep.subr.bf16.mxu1 %v2721_v46  ;;  %v2883_v14 = vsub.f32 %v1217_v63, %v1262_v11  ;;  %v1349_v41 = vsub.f32 %v2857_v55, %v1348_v37 }
 0x1c8   :  { %v2422_v26 = vpack.c.bf16 %v802_v24, %v795_v25  ;;  %v1314_v24 = vsub.f32 %v2843_v43, %v1313_v21  ;;  %v1321_v25 = vsub.f32 %v2845_v44, %v1320_v22 }
 0x1c9   :  { %v1350_v49 = vand.u32 4294901760, %v1349_v41 }
 0x1ca   :  { %2423 = vmatpush3.bf16.msra.mxu1 %v2422_v26  ;;  %v1315_v26 = vand.u32 4294901760, %v1314_v24  ;;  %v1322_v27 = vand.u32 4294901760, %v1321_v25 }
 0x1cb   :  { %2424 = vmatprep.subr.bf16.mxu1 %v2721_v46 }
 0x1cc   :  { %v2929_v30 = vpack.c.bf16 %v1322_v27, %v1315_v26 }
 0x1cd   :  { %2132 = vmatmul.mubr.f32.vlgmr.msra.gmra.mrb[0].mxu1 %v2811_v50 }
 0x1ce   :  { %2426 = vmatpush3.bf16.msra.mxu1 %v2425_v6  ;;  %2142 = vmatprep.mubr.msk.f32.mxu1 %vm2722_vm1, %v2723_v47  ;;  %v2869_v6 = vsub.f32 %v1212_v48, %v1247_v59 }
 0x1cf   :  { %2427 = vmatprep.subr.bf16.mxu1 %v2721_v46 }
 0x1d0   :  { %v1376_v63 = vand.u32 4294901760, %v2869_v6 }
 0x1d2   :  { %2429 = vmatpush3.bf16.msra.mxu1 %v2428_v19  ;;  %v2907_v19 = vpack.c.bf16 %v1259_v9, %v1256_v3 }
 0x1d3   :  { %2430 = vmatprep.subr.bf16.mxu1 %v2721_v46 }
 0x1d5   :  { %2143 = vmatmul.mubr.f32.vlgmr.msra.gmra.mrb[0].mxu1 %v767_v51  ;;  %v2849_v51 = vpack.c.bf16 %v1229_v36, %v1226_v33  ;;  %v1335_v33 = vsub.f32 %v2851_v52, %v1334_v29  ;;  %v1341_v36 = vand.u32 4294901760, %v2853_v53 }
 0x1d6   :  { %2432 = vmatpush3.bf16.msra.mxu1 %v2413_v1  ;;  %2153 = vmatprep.mubr.msk.f32.mxu1 %vm2722_vm1, %v2723_v47 }
 0x1d7   :  { %2433 = vmatprep.subr.bf16.mxu1 %v2721_v46  ;;  %2525 = vmatpush3.bf16.msra.mxu0 %v2849_v51  ;;  %v1336_v35 = vand.u32 4294901760, %v1335_v33  ;;  %v2939_v39 = vpack.c.bf16 %v1348_v37, %v1341_v36  ;;  %v1397_v33 = vand.u32 4294901760, %v2877_v10 }
 0x1d8   :  { %2526 = vmatprep.subr.bf16.mxu0 %v2721_v46 }
 0x1d9   :  { %v2937_v38 = vpack.c.bf16 %v1336_v35, %v1329_v34  ;;  %v1398_v37 = vsub.f32 %v2877_v10, %v1397_v33 }
 0x1da   :  { %2435 = vmatpush3.bf16.msra.mxu1 %v2416_v12 }
 0x1db   :  { %2436 = vmatprep.subr.bf16.mxu1 %v2721_v46  ;;  %2528 = vmatpush3.bf16.msra.mxu0 %v2867_v5  ;;  %v1399_v41 = vand.u32 4294901760, %v1398_v37 }
 0x1dc   :  { %2529 = vmatprep.subr.bf16.mxu0 %v2721_v46 }
 0x1dd   :  { %2154 = vmatmul.mubr.f32.vlgmr.msra.gmra.mrb[0].mxu1 %v768_v57  ;;  %v1241_v57 = vand.u32 4294901760, %v1210_v40 }
 0x1de   :  { %2438 = vmatpush3.bf16.msra.mxu1 %v2437_v13  ;;  %2164 = vmatprep.mubr.msk.f32.mxu1 %vm2722_vm1, %v2723_v47  ;;  %v2881_v13 = vsub.f32 %v1216_v62, %v1259_v9  ;;  %v1369_v62 = vand.u32 4294901760, %v2865_v2 }
 0x1df   :  { %2439 = vmatprep.subr.bf16.mxu1 %v2721_v46  ;;  %v2889_v16 = vpack.c.bf16 %v1241_v57, %v1238_v56 }
 0x1e0   :  { %v1370_v9 = vsub.f32 %v2865_v2, %v1369_v62  ;;  %v1404_v34 = vand.u32 4294901760, %v2881_v13 }
 0x1e1   :  { %2531 = vmatpush3.bf16.msra.mxu0 %v2889_v16 }
 0x1e2   :  { %2441 = vmatpush3.bf16.msra.mxu1 %v2440_v23  ;;  %2532 = vmatprep.subr.bf16.mxu0 %v2721_v46  ;;  %v2923_v23 = vpack.c.bf16 %v1320_v22, %v1313_v21  ;;  %v1383_v22 = vand.u32 4294901760, %v2871_v7 }
 0x1e3   :  { %2442 = vmatprep.subr.bf16.mxu1 %v2721_v46 }
 0x1e4   :  { %v1384_v27 = vsub.f32 %v2871_v7, %v1383_v22 }
 0x1e5   :  { %2165 = vmatmul.mubr.f32.vlgmr.msra.gmra.mrb[0].mxu1 %v2811_v50  ;;  %2534 = vmatpush3.bf16.msra.mxu0 %v2895_v17 }
 0x1e6   :  { %2444 = vmatpush3.bf16.msra.mxu1 %v2413_v1  ;;  %2175 = vmatprep.mubr.msk.f32.mxu1 %vm2722_vm1, %v2723_v47  ;;  %v2863_v1 = vsub.f32 %v1210_v40, %v1241_v57  ;;  %v1342_v40 = vsub.f32 %v2853_v53, %v1341_v36  ;;  %v1385_v29 = vand.u32 4294901760, %v1384_v27  ;;  %v2971_v36 = vpack.c.bf16 %v1404_v34, %v1397_v33 }
 0x1e7   :  { %2445 = vmatprep.subr.bf16.mxu1 %v2721_v46  ;;  %2535 = vmatprep.subr.bf16.mxu0 %v2721_v46  ;;  %v2515_v27 = vpack.c.bf16 %v2881_v13, %v2877_v10 }
 0x1e8   :  { %v1343_v48 = vand.u32 4294901760, %v1342_v40  ;;  %v1362_v54 = vand.u32 4294901760, %v2863_v1  ;;  %v1405_v40 = vsub.f32 %v2881_v13, %v1404_v34 }
 0x1ea   :  { %2447 = vmatpush3.bf16.msra.mxu1 %v2416_v12  ;;  %v1265_v12 = vand.u32 4294901760, %v1218_v4  ;;  %v2945_v56 = vpack.c.bf16 %v1350_v49, %v1343_v48  ;;  %v1363_v59 = vsub.f32 %v2863_v1, %v1362_v54  ;;  %v1406_v48 = vand.u32 4294901760, %v1405_v40  ;;  %v1191_v40 = vld [vmem:[%s3120_s3] sm:$0x1]  ;;  %s2724_s3 = smov [#allocation7]  }
 0x1eb   :  { %2448 = vmatprep.subr.bf16.mxu1 %v2721_v46  ;;  %v1411_v49 = vand.u32 4294901760, %v2883_v14  ;;  %vm1192_vm3 = vcmp.gt.f32.partialorder %v1191_v40, 0.0 }
 0x1ec   :  { %v2885_v15 = vsub.f32 %v1218_v4, %v1265_v12  ;;  %v2913_v20 = vpack.c.bf16 %v1265_v12, %v1262_v11  ;;  %v2955_v4 = vpack.c.bf16 %v1376_v63, %v1369_v62  ;;  %v1377_v11 = vsub.f32 %v2869_v6, %v1376_v63 }
 0x1ed   :  { %2176 = vmatmul.mubr.f32.vlgmr.msra.gmra.mrb[0].mxu1 %v2811_v50  ;;  %v1214_v50 = vld [vmem:[#allocation5 + $0x58] sm:$0xff]  ;;  %v1371_v12 = vand.u32 4294901760, %v1370_v9  ;;  %v2497_v9 = vpack.c.bf16 %v2845_v44, %v2843_v43 }
 0x1ee   :  { %2210 = vmatprep.mubr.msk.f32.mxu1 %vm2722_vm1, %v2723_v47  ;;  %2450 = vmatpush3.bf16.msra.mxu1 %v2841_v42  ;;  %v1253_v61 = vand.u32 4294901760, %v1214_v50  ;;  %v1378_v21 = vand.u32 4294901760, %v1377_v11  ;;  %v2500_v11 = vpack.c.bf16 %v2851_v52, %v2847_v45 }
 0x1ef   :  { %2451 = vmatprep.subr.bf16.mxu1 %v2721_v46 }
 0x1f0   :  { %v2875_v8 = vsub.f32 %v1214_v50, %v1253_v61  ;;  %v2901_v18 = vpack.c.bf16 %v1253_v61, %v1250_v60  ;;  %v1355_v50 = vand.u32 4294901760, %v2861_v0  ;;  %v1364_v61 = vand.u32 4294901760, %v1363_v59 }
 0x1f1   :  { %v2961_v25 = vpack.c.bf16 %v1378_v21, %v1371_v12  ;;  %v1412_v59 = vsub.f32 %v2883_v14, %v1411_v49  ;;  %v2503_v12 = vpack.c.bf16 %v2857_v55, %v2853_v53  ;;  %v2506_v21 = vpack.c.bf16 %v2863_v1, %v2861_v0 }
 0x1f2   :  { %2453 = vmatpush3.bf16.msra.mxu1 %v2849_v51  ;;  %2537 = vmatpush3.bf16.msra.mxu0 %v2901_v18  ;;  %v2947_v57 = vpack.c.bf16 %v1362_v54, %v1355_v50  ;;  %v1356_v58 = vsub.f32 %v2861_v0, %v1355_v50  ;;  %v1390_v24 = vand.u32 4294901760, %v2875_v8  ;;  %v1418_v50 = vand.u32 4294901760, %v2885_v15 }
 0x1f3   :  { %2454 = vmatprep.subr.bf16.mxu1 %v2721_v46  ;;  %2538 = vmatprep.subr.bf16.mxu0 %v2721_v46  ;;  %v2977_v54 = vpack.c.bf16 %v1406_v48, %v1399_v41 }
 0x1f4   :  { %v1357_v60 = vand.u32 4294901760, %v1356_v58  ;;  %v2963_v26 = vpack.c.bf16 %v1390_v24, %v1383_v22  ;;  %v1391_v28 = vsub.f32 %v2875_v8, %v1390_v24  ;;  %v2979_v58 = vpack.c.bf16 %v1418_v50, %v1411_v49 }
 0x1f5   :  { %v2509_v22 = vpack.c.bf16 %v2869_v6, %v2865_v2  ;;  %v2512_v24 = vpack.c.bf16 %v2875_v8, %v2871_v7 }
 0x1f6   :  { %2456 = vmatpush3.bf16.msra.mxu1 %v2867_v5  ;;  %2540 = vmatpush3.bf16.msra.mxu0 %v2907_v19  ;;  %v2953_v3 = vpack.c.bf16 %v1364_v61, %v1357_v60  ;;  %v1392_v32 = vand.u32 4294901760, %v1391_v28  ;;  %v1419_v60 = vsub.f32 %v2885_v15, %v1418_v50  ;;  %v1413_v61 = vand.u32 4294901760, %v1412_v59 }
 0x1f7   :  { %2457 = vmatprep.subr.bf16.mxu1 %v2721_v46  ;;  %2541 = vmatprep.subr.bf16.mxu0 %v2721_v46 }
 0x1f8   :  { %v2969_v35 = vpack.c.bf16 %v1392_v32, %v1385_v29  ;;  %v1420_v62 = vand.u32 4294901760, %v1419_v60 }
 0x1fa   :  { %2459 = vmatpush3.bf16.msra.mxu1 %v2889_v16  ;;  %2543 = vmatpush3.bf16.msra.mxu0 %v2913_v20  ;;  %v2983_v63 = vpack.c.bf16 %v1420_v62, %v1413_v61 }
 0x1fb   :  { %2460 = vmatprep.subr.bf16.mxu1 %v2721_v46  ;;  %2544 = vmatprep.subr.bf16.mxu0 %v2721_v46 }
 0x1fe   :  { %2462 = vmatpush3.bf16.msra.mxu1 %v2895_v17 }
 0x1ff   :  { %2463 = vmatprep.subr.bf16.mxu1 %v2721_v46 }
 0x202   :  { %2465 = vmatpush3.bf16.msra.mxu1 %v2901_v18 }
 0x203   :  { %2466 = vmatprep.subr.bf16.mxu1 %v2721_v46 }
 0x206   :  { %2468 = vmatpush3.bf16.msra.mxu1 %v2907_v19 }
 0x207   :  { %2469 = vmatprep.subr.bf16.mxu1 %v2721_v46 }
 0x20a   :  { %2471 = vmatpush3.bf16.msra.mxu1 %v2913_v20 }
 0x20b   :  { %2472 = vmatprep.subr.bf16.mxu1 %v2721_v46 }
 0x2c0   :  { %v1178_v29 = vpop.f32.mrb[0].mxu1 }
 0x2c1   :  { %v1882_v32 = vmul.f32 -1.442695, %v1178_v29  ;;  %v2177_v33 = vpop.f32.mrb[1].mxu1 }
 0x2c3   :  { %2639 = vpow2.f32 %v1882_v32 }
 0x2cd   :  { %v2640_v34 = vpop.eup %2639 }
 0x2ce   :  { %v1185_v37 = vadd.f32 1.0, %v2640_v34 }
 0x2d0   :  { %2641 = vrcp.f32 %v1185_v37 }
 0x2da   :  { %v2642_v41 = vpop.eup %2641 }
 0x2db   :  { %vm1188_vm4 = vcmp.gt.f32.partialorder %v2642_v41, 0.5  ;;  %v1197_v59 = vsub.f32 1.0, %v2642_v41 }
 0x2dc   :  { %v1883_v48 = vsel %vm1188_vm4, 1.0, %v2723_v47 }
 0x2dd   :  { %v1193_v49 = vsel %vm1192_vm3, 1.0, %v1883_v48  ;;  %v1196_v50 = vsub.f32 1.0, %v1883_v48  ;;  %v1195_v60 = vmul.f32 %v2642_v41, %v1883_v48 }
 0x2de   :  { %1194 = vst [vmem:[%s3122_s5] sm:$0x1] %v1193_v49  ;;  %s1870_s5 = sshll.u32 %s2724_s3, 4  ;;  %s1871_s5 = int_to_ptr.vmem [resolvable:$true] %s1870_s5 }
 0x2df   :  { %v1198_v61 = vmul.f32 %v1197_v59, %v1196_v50  ;;  %s2689_s29 = scalar_lea.vmem %s1871_s5, 16  ;;  %s2693_s30 = scalar_lea.vmem %s1871_s5, 32 }
 0x2e0   :  { %p2690_p2 = scmp.ne.s32.totalorder %s1871_s5, %s2689_s29  ;;  %p2694_p3 = scmp.lt.s32.totalorder %s1871_s5, %s1871_s5 }
 0x2e1   :  { %v1199_v62 = vadd.f32 %v1198_v61, %v1195_v60  ;;  %p2695_p4 = scmp.lt.s32.totalorder %s2693_s30, %s2689_s29 }
 0x2e3   :  { %v1200_v29 = vadd.f32 1e-08, %v1199_v62  ;;  %p2696_p5 = por %p2695_p4, %p2694_p3 }
 0x2e5   :  { %2643 = vlog2.f32 %v1200_v29  ;;  %p2697_p6 = pnand %p2696_p5, %p2690_p2 }
 0x2ef   :  { %v2644_v32 = vpop.eup %2643 }
 0x2f0   :  { %v1202_v33 = vmul.f32 0.6931472, %v2644_v32 }
 0x2f2   :  { %v3008_v34 = vand.u32 4294901760, %v1202_v33 }
 0x2f4   :  { %v3011_v37 = vsub.f32 %v1202_v33, %v3008_v34 }
 0x2f6   :  { %v1302_v40 = vand.u32 4294901760, %v3011_v37 }
 0x2f8   :  { %2316 = vmatmul.mubr.f32.vlgmr.msra.gmra.mrb[4].mxu0 %v1302_v40  ;;  %v1303_v28 = vsub.f32 %v3011_v37, %v1302_v40 }
 0x2f9   :  { %2546 = vmatpush3.bf16.msra.mxu0 %v2923_v23  ;;  %2350 = vmatprep.mubr.msk.f32.mxu0 %vm2722_vm1, %v2723_v47 }
 0x2fa   :  { %2547 = vmatprep.subr.bf16.mxu0 %v2721_v46  ;;  %v1304_v41 = vand.u32 4294901760, %v1303_v28 }
 0x2fc   :  { %2211 = vmatmul.mubr.f32.vlgmr.msra.gmra.mrb[2].mxu1 %v1304_v41 }
 0x2fd   :  { %2474 = vmatpush3.bf16.msra.mxu1 %v2929_v30  ;;  %2549 = vmatpush3.bf16.msra.mxu0 %v2931_v31 }
 0x2fe   :  { %2475 = vmatprep.subr.bf16.mxu1 %v2721_v46  ;;  %2550 = vmatprep.subr.bf16.mxu0 %v2721_v46 }
 0x2ff   :  { %2245 = vmatprep.mubr.msk.f32.mxu1 %vm2722_vm1, %v2723_v47 }
 0x301   :  { %2477 = vmatpush3.bf16.msra.mxu1 %v2937_v38  ;;  %2552 = vmatpush3.bf16.msra.mxu0 %v2939_v39 }
 0x302   :  { %2478 = vmatprep.subr.bf16.mxu1 %v2721_v46  ;;  %2553 = vmatprep.subr.bf16.mxu0 %v2721_v46 }
 0x305   :  { %2480 = vmatpush3.bf16.msra.mxu1 %v2945_v56  ;;  %2555 = vmatpush3.bf16.msra.mxu0 %v2947_v57 }
 0x306   :  { %2481 = vmatprep.subr.bf16.mxu1 %v2721_v46  ;;  %2556 = vmatprep.subr.bf16.mxu0 %v2721_v46 }
 0x309   :  { %2483 = vmatpush3.bf16.msra.mxu1 %v2953_v3  ;;  %2558 = vmatpush3.bf16.msra.mxu0 %v2955_v4 }
 0x30a   :  { %2484 = vmatprep.subr.bf16.mxu1 %v2721_v46  ;;  %2559 = vmatprep.subr.bf16.mxu0 %v2721_v46 }
 0x30d   :  { %2486 = vmatpush3.bf16.msra.mxu1 %v2961_v25  ;;  %2561 = vmatpush3.bf16.msra.mxu0 %v2963_v26 }
 0x30e   :  { %2487 = vmatprep.subr.bf16.mxu1 %v2721_v46  ;;  %2562 = vmatprep.subr.bf16.mxu0 %v2721_v46 }
 0x311   :  { %2489 = vmatpush3.bf16.msra.mxu1 %v2969_v35  ;;  %2564 = vmatpush3.bf16.msra.mxu0 %v2971_v36 }
 0x312   :  { %2490 = vmatprep.subr.bf16.mxu1 %v2721_v46  ;;  %2565 = vmatprep.subr.bf16.mxu0 %v2721_v46 }
 0x315   :  { %2492 = vmatpush3.bf16.msra.mxu1 %v2977_v54  ;;  %2567 = vmatpush3.bf16.msra.mxu0 %v2979_v58 }
 0x316   :  { %2493 = vmatprep.subr.bf16.mxu1 %v2721_v46  ;;  %2568 = vmatprep.subr.bf16.mxu0 %v2721_v46 }
 0x318   :  { %2351 = vmatmul.mubr.f32.vlgmr.msra.gmra.mrb[4].mxu0 %v3008_v34 }
 0x319   :  { %2495 = vmatpush3.bf16.msra.mxu1 %v2983_v63  ;;  %2570 = vmatpush3.bf16.msra.mxu0 %v2841_v42 }
 0x31a   :  { %2496 = vmatprep.subr.bf16.mxu1 %v2721_v46  ;;  %2571 = vmatprep.subr.bf16.mxu0 %v2721_v46 }
 0x31b   :  { %2385 = vmatprep.mubr.msk.f32.mxu0 %vm2722_vm1, %v2723_v47 }
 0x31c   :  { %2246 = vmatmul.mubr.f32.vlgmr.msra.gmra.mrb[2].mxu1 %v3008_v34 }
 0x31d   :  { %2498 = vmatpush3.bf16.msra.mxu1 %v2497_v9  ;;  %2573 = vmatpush3.bf16.msra.mxu0 %v2849_v51 }
 0x31e   :  { %2499 = vmatprep.subr.bf16.mxu1 %v2721_v46  ;;  %2574 = vmatprep.subr.bf16.mxu0 %v2721_v46 }
 0x31f   :  { %2280 = vmatprep.mubr.msk.f32.mxu1 %vm2722_vm1, %v2723_v47  ;;  %v3124_v47 = vpack.c.bf16 %v2885_v15, %v2883_v14 }
 0x321   :  { %2501 = vmatpush3.bf16.msra.mxu1 %v2500_v11  ;;  %2576 = vmatpush3.bf16.msra.mxu0 %v2867_v5 }
 0x322   :  { %2502 = vmatprep.subr.bf16.mxu1 %v2721_v46  ;;  %2577 = vmatprep.subr.bf16.mxu0 %v2721_v46 }
 0x325   :  { %2504 = vmatpush3.bf16.msra.mxu1 %v2503_v12  ;;  %2579 = vmatpush3.bf16.msra.mxu0 %v2889_v16 }
 0x326   :  { %2505 = vmatprep.subr.bf16.mxu1 %v2721_v46  ;;  %2580 = vmatprep.subr.bf16.mxu0 %v2721_v46 }
 0x329   :  { %2507 = vmatpush3.bf16.msra.mxu1 %v2506_v21  ;;  %2582 = vmatpush3.bf16.msra.mxu0 %v2895_v17 }
 0x32a   :  { %2508 = vmatprep.subr.bf16.mxu1 %v2721_v46  ;;  %2583 = vmatprep.subr.bf16.mxu0 %v2721_v46 }
 0x32d   :  { %2510 = vmatpush3.bf16.msra.mxu1 %v2509_v22  ;;  %2585 = vmatpush3.bf16.msra.mxu0 %v2901_v18 }
 0x32e   :  { %2511 = vmatprep.subr.bf16.mxu1 %v2721_v46  ;;  %2586 = vmatprep.subr.bf16.mxu0 %v2721_v46 }
 0x331   :  { %2513 = vmatpush3.bf16.msra.mxu1 %v2512_v24  ;;  %2588 = vmatpush3.bf16.msra.mxu0 %v2907_v19 }
 0x332   :  { %2514 = vmatprep.subr.bf16.mxu1 %v2721_v46  ;;  %2589 = vmatprep.subr.bf16.mxu0 %v2721_v46 }
 0x335   :  { %2516 = vmatpush3.bf16.msra.mxu1 %v2515_v27  ;;  %2591 = vmatpush3.bf16.msra.mxu0 %v2913_v20 }
 0x336   :  { %2517 = vmatprep.subr.bf16.mxu1 %v2721_v46 }
 0x338   :  { %2386 = vmatmul.mubr.f32.vlgmr.msra.gmra.mrb[4].mxu0 %v3008_v34 }
 0x339   :  { %2519 = vmatpush3.bf16.msra.mxu1 %v3124_v47 }
 0x33c   :  { %2281 = vmatmul.mubr.f32.vlgmr.msra.gmra.mrb[2].mxu1 %v3011_v37 }
 0x40b   :  { %v1856_v42 = vpop.f32.mrb[4].mxu0 }
 0x40c   :  { %v2387_v43 = vpop.f32.mrb[5].mxu0 }
 0x40f   :  { %v1561_v44 = vpop.f32.mrb[2].mxu1 }
 0x410   :  { %v2592_v45 = vadd.f32 %v1856_v42, %v1561_v44  ;;  %v2282_v51 = vpop.f32.mrb[3].mxu1 }
 0x412   :  { %1861 = vst.msk [vmem:[#allocation7] sm:$0x1] %vm1860_vm5, %v2592_v45 }
 0x413   :  { %2700 = shalt.err (!%p2697_p6)
}
 0x414   :  { %s2701_s9 = scalar_lea.hbm %s3123_s6, 16 }
 0x415   :  { %p2702_p7 = scmp.ne.s32.totalorder %s3123_s6, %s2701_s9  ;;  %p2705_p8 = scmp.lt.u32.totalorder %s2701_s9, %s3123_s6 }
 0x417   :  { %p2707_p9 = pnand %p2705_p8, %p2702_p7 }
 0x419   :  { %2710 = shalt.err (!%p2707_p9)
}
 0x41a   :  { %1873 = dma.vmem_to_hbm [thread:$0]  %s1871_s5, 16, %s3123_s6, [#allocation4]  }
 0x41b   :  { %2715 = dma.done.wait [#allocation4], 16  }
 0x41c   :  { %2716 = vsyncadd [#allocation4], 4294967280 }
 0x41d   :  { %1879 = vsyncpa [#allocation3], 1 }
 0x41e   :  { %1880 = vsyncpa [#allocation6], 1 }
 0x41f   :  { %1881 = vsyncpa [#allocation4], 1 }

</bundles_post_ra>
